<compile_context>
chip_gen: v6e
topology: v6e:2x2x1
jax: 0.10.0
libtpu: 0.0.40
codegen_flags: <defaults>
</compile_context>

<pallas_src>
import functools

import jax
import jax.numpy as jnp
import numpy as np
from jax import lax
from jax.experimental import pallas as pl
from jax.experimental.pallas import tpu as pltpu


def _round_up(v, m):
    return (v + m - 1) // m * m


def _vmem_capacity_bytes(default=64 * 1024 * 1024):
    # v5e/v6e: 128 MiB physical VMEM, v7x: 64 MiB.  Fall back to the v7x bound.
    try:
        info = pltpu.get_tpu_info()
        cap = int(getattr(info, "vmem_capacity_bytes", default))
        return cap if cap > 0 else default
    except Exception:
        return default


def _padded_bytes(rows, cols, itemsize):
    # VMEM footprint of a (rows, cols) block: sublanes pad to 8, lanes to 128.
    return (_round_up(max(int(rows), 1), 8)
            * _round_up(max(int(cols), 1), 128) * itemsize)


def _choose_tile(m, n, fp, x_itemsize, c_itemsize, o_itemsize, vmem_cap, gran):
    """Pick tile_m + vmem_limit_bytes, accounting for the resident DFT matrices."""
    # Constant-index_map matrices are DMA'd once but still get 2 pipeline
    # buffers each: COS_T (n, fp), MSIN_T (n, fp), IRE (fp, n), IIM (fp, n).
    const_bytes = 2 * 2 * (_padded_bytes(n, fp, c_itemsize)
                           + _padded_bytes(fp, n, c_itemsize))

    def per_tile(t):
        return (2 * _padded_bytes(t, n, x_itemsize)      # x block (2 buffers)
                + 4 * _padded_bytes(t, n, o_itemsize)    # res + season (2 buffers each)
                + 2 * _padded_bytes(t, 1, 4)             # kth block (2 buffers)
                + 8 * _padded_bytes(t, fp, 4))           # f32 spectrum temporaries

    budget = max(int(min(vmem_cap, 128 << 20) * 0.6) - const_bytes, 1 << 20)
    tile = gran
    while tile < min(m, 8192) and per_tile(2 * tile) <= budget:
        tile *= 2
    # v7x has 2 TensorCores and the pipeline needs >=2 steps: keep >= ~4 grid
    # steps whenever M allows it instead of a single maximal tile.
    if m > 2 * gran:
        tile = min(tile, _round_up(-(-m // 4), gran))
    tile = max(gran, min(tile, _round_up(m, gran)))

    vmem_limit = const_bytes + per_tile(tile) + (8 << 20)
    vmem_limit = int(min(max(vmem_limit, 32 << 20), int(vmem_cap * 0.9)))
    return tile, vmem_limit


def _dft_matrices(n, f, fp, dtype):
    """Row-major real-DFT matrices; frequency axis zero-padded to fp.

    rfft:   Xr = x @ cos_t,  Xi = x @ msin_t        (cos_t, msin_t: (n, fp))
    irfft:  x  = Xr @ ire + Xi @ iim                (ire, iim:      (fp, n))
    Padded frequency rows/columns are zero; they only add zero-magnitude
    candidates to the per-row top-k (top_k <= f), so the threshold is unchanged.
    """
    nn = np.arange(n, dtype=np.float64)
    ff = np.arange(f, dtype=np.float64)
    ang = 2.0 * np.pi * np.outer(nn, ff) / n                  # (n, f)
    cos_t = np.zeros((n, fp), dtype=np.float64)
    msin_t = np.zeros((n, fp), dtype=np.float64)
    cos_t[:, :f] = np.cos(ang)
    msin_t[:, :f] = -np.sin(ang)
    # irfft weights: 1/n for DC and Nyquist bins, 2/n for the rest.
    w = np.where((ff == 0) | (ff == n // 2), 1.0, 2.0) / n    # (f,)
    ire = np.zeros((fp, n), dtype=np.float64)
    iim = np.zeros((fp, n), dtype=np.float64)
    ire[:f, :] = w[:, None] * np.cos(ang.T)
    iim[:f, :] = -w[:, None] * np.sin(ang.T)
    return tuple(jnp.asarray(a, dtype=dtype) for a in (cos_t, msin_t, ire, iim))


def _kth_kernel(x_ref, cos_ref, msin_ref, kth_ref, *, top_k, rows_slice0,
                tile_m, compute_dtype):
    """Pass 1: per-row k-th largest |rfft(x)|^2 (exact / tie-safe)."""
    xc = x_ref[...].astype(compute_dtype)                       # (tile_m, N)
    xr = jnp.dot(xc, cos_ref[...], preferred_element_type=jnp.float32)
    xi = jnp.dot(xc, msin_ref[...], preferred_element_type=jnp.float32)
    freq2 = xr * xr + xi * xi                                   # (tile_m, Fp)

    # torch: freq[0] = 0  ->  zero the entire first slice along dim 0 of x,
    # i.e. the first `rows_slice0` flattened rows.
    row = pl.program_id(0) * tile_m + lax.broadcasted_iota(
        jnp.int32, (tile_m, 1), 0)
    freq2 = jnp.where(row < rows_slice0, 0.0, freq2)

    # Exact, tie-safe k-th largest per row: remove exactly ONE occurrence of
    # the current max per iteration (k-1 removals); matches
    # torch.topk(freq, k).values.min() even with duplicate magnitudes.
    # (For large Fp*k a packed-key single-reduce variant would halve the
    # cross-lane reduction work; irrelevant at these sizes.)
    fpad = freq2.shape[1]
    cidx = lax.broadcasted_iota(jnp.int32, freq2.shape, 1)
    work = freq2
    for _ in range(top_k - 1):
        rmax = jnp.max(work, axis=1, keepdims=True)
        first = jnp.min(jnp.where(work == rmax, cidx, fpad), axis=1,
                        keepdims=True)
        work = jnp.where(cidx == first, -jnp.inf, work)
    kth_ref[...] = jnp.max(work, axis=1, keepdims=True)         # (tile_m, 1)


def _decompose_kernel(thr_ref, x_ref, cos_ref, msin_ref, ire_ref, iim_ref,
                      res_ref, season_ref, *, rows_slice0, tile_m,
                      compute_dtype):
    """Pass 2: recompute spectrum, mask with global threshold, inverse DFT."""
    thr2 = thr_ref[0, 0]                                        # global |X|^2 threshold
    x = x_ref[...]                                              # (tile_m, N), orig dtype
    xc = x.astype(compute_dtype)
    xr = jnp.dot(xc, cos_ref[...], preferred_element_type=jnp.float32)
    xi = jnp.dot(xc, msin_ref[...], preferred_element_type=jnp.float32)
    freq2 = xr * xr + xi * xi
    row = pl.program_id(0) * tile_m + lax.broadcasted_iota(
        jnp.int32, (tile_m, 1), 0)
    freq2 = jnp.where(row < rows_slice0, 0.0, freq2)

    keep = freq2 > thr2                                         # torch: xf[freq <= thr] = 0
    xr_m = jnp.where(keep, xr, 0.0).astype(compute_dtype)
    xi_m = jnp.where(keep, xi, 0.0).astype(compute_dtype)

    # Split inverse DFT (no Re/Im concatenate): season = Xr@IRE + Xi@IIM.
    season = (jnp.dot(xr_m, ire_ref[...], preferred_element_type=jnp.float32)
              + jnp.dot(xi_m, iim_ref[...], preferred_element_type=jnp.float32))
    season_ref[...] = season.astype(season_ref.dtype)           # in-kernel dtype cast
    res_ref[...] = (x.astype(jnp.float32) - season).astype(res_ref.dtype)


def fourier_topk_decomposition(x, top_k=5, *, compute_dtype=None):
    """Pallas TPU forward of the PyTorch module: returns (x_residual, x_season).

    x keeps its natural (..., N) layout end-to-end; bf16 inputs feed bf16 MXU
    operands (f32 accumulation), f32 inputs stay f32 so the FFT round trip
    holds a 2e-3 tolerance.
    """
    orig_shape = x.shape
    orig_dtype = x.dtype
    assert x.ndim >= 2, "freq[0]=0 slice semantics assume a leading batch axis"
    n = int(orig_shape[-1])
    assert n % 2 == 0, "irfft(rfft(x)) only round-trips exactly for an even last dim"
    f = n // 2 + 1
    top_k = int(top_k)
    assert 1 <= top_k <= f
    fp = _round_up(f, 8)                     # pad freq axis (zero columns/rows)

    m = int(np.prod(orig_shape[:-1]))
    rows_slice0 = int(np.prod(orig_shape[1:-1]))

    if compute_dtype is None:
        compute_dtype = (orig_dtype
                         if orig_dtype in (jnp.bfloat16, jnp.float32)
                         else jnp.float32)
    compute_dtype = jnp.dtype(compute_dtype)

    x2 = x.reshape(m, n)                     # layout no-op: no cast, no transpose
    cos_t, msin_t, ire, iim = _dft_matrices(n, f, fp, compute_dtype)

    x_itemsize = jnp.dtype(orig_dtype).itemsize
    gran = 8 if x_itemsize >= 4 else 16      # sublane granularity of the blocks
    tile_m, vmem_limit = _choose_tile(
        m, n, fp, x_itemsize, compute_dtype.itemsize, x_itemsize,
        _vmem_capacity_bytes(), gran)
    grid = (pl.cdiv(m, tile_m),)
    cparams = pltpu.CompilerParams(dimension_semantics=("parallel",),
                                   vmem_limit_bytes=vmem_limit)

    x_spec = pl.BlockSpec((tile_m, n), lambda i: (i, 0))
    # Constant index_maps: the small DFT matrices are DMA'd once and stay
    # VMEM-resident across the whole M grid.
    cos_spec = pl.BlockSpec((n, fp), lambda i: (0, 0))
    msin_spec = pl.BlockSpec((n, fp), lambda i: (0, 0))
    ire_spec = pl.BlockSpec((fp, n), lambda i: (0, 0))
    iim_spec = pl.BlockSpec((fp, n), lambda i: (0, 0))

    # ---- pass 1: per-row k-th largest |X|^2 ----
    kth = pl.pallas_call(
        functools.partial(_kth_kernel, top_k=top_k, rows_slice0=rows_slice0,
                          tile_m=tile_m, compute_dtype=compute_dtype),
        grid=grid,
        in_specs=[x_spec, cos_spec, msin_spec],
        out_specs=pl.BlockSpec((tile_m, 1), lambda i: (i, 0)),
        out_shape=jax.ShapeDtypeStruct((m, 1), jnp.float32),
        compiler_params=cparams,
    )(x2, cos_t, msin_t)

    # Global threshold = min over all rows of the per-row k-th value
    # (torch's top_k_freq.min()); trivial XLA reduce between the two passes.
    thr2 = jnp.min(kth).reshape(1, 1)

    # ---- pass 2: mask + inverse DFT + residual, outputs in natural layout ----
    res2, season2 = pl.pallas_call(
        functools.partial(_decompose_kernel, rows_slice0=rows_slice0,
                          tile_m=tile_m, compute_dtype=compute_dtype),
        grid=grid,
        in_specs=[pl.BlockSpec(memory_space=pltpu.MemorySpace.SMEM),
                  x_spec, cos_spec, msin_spec, ire_spec, iim_spec],
        out_specs=(pl.BlockSpec((tile_m, n), lambda i: (i, 0)),
                   pl.BlockSpec((tile_m, n), lambda i: (i, 0))),
        out_shape=(jax.ShapeDtypeStruct((m, n), orig_dtype),
                   jax.ShapeDtypeStruct((m, n), orig_dtype)),
        compiler_params=cparams,
    )(thr2, x2, cos_t, msin_t, ire, iim)

    return res2.reshape(orig_shape), season2.reshape(orig_shape)


def _reference(x, top_k=5):
    # Pure-JAX mirror of the PyTorch forward (validation only).
    xf = jnp.fft.rfft(x, axis=-1)
    freq = jnp.abs(xf)
    freq = freq.at[0].set(0.0)
    thr = jnp.min(jax.lax.top_k(freq, top_k)[0])
    xf = jnp.where(freq <= thr, 0.0 + 0.0j, xf)
    season = jnp.fft.irfft(xf, n=x.shape[-1], axis=-1).astype(x.dtype)
    return x - season, season


if __name__ == "__main__":
    key = jax.random.PRNGKey(0)
    x = jax.random.normal(key, (2, 4, 16, 16), dtype=jnp.float32)

    res, season = fourier_topk_decomposition(x, top_k=5)
    jax.block_until_ready((res, season))

    ref_res, ref_season = _reference(x, top_k=5)
    assert jnp.max(jnp.abs(season - ref_season)) < 2e-3, "season mismatch"
    assert jnp.max(jnp.abs(res - ref_res)) < 2e-3, "residual mismatch"

    print("KERNEL_OK")
</pallas_src>

<mosaic_0001>
module attributes {stable_mosaic.version = 11 : i64} {
  func.func @_kth_kernel(%arg0: i32, %arg1: memref<32x16xf32, #tpu.memory_space<vmem>>, %arg2: memref<16x16xf32, #tpu.memory_space<vmem>>, %arg3: memref<16x16xf32, #tpu.memory_space<vmem>>, %arg4: memref<32x1xf32, #tpu.memory_space<vmem>>) attributes {dimension_semantics = [#tpu.dimension_semantics<parallel>], iteration_bounds = array<i64: 4>, scalar_prefetch = 0 : i64, scratch_operands = 0 : i64, tpu.core_type = #tpu.core_type<tc>, window_params = [{transform_indices = @transform_0, window_bounds = array<i64: 32, 16>}, {pipeline_mode = #tpu.pipeline_mode<synchronous>, transform_indices = @transform_1, window_bounds = array<i64: 16, 16>}, {pipeline_mode = #tpu.pipeline_mode<synchronous>, transform_indices = @transform_2, window_bounds = array<i64: 16, 16>}, {transform_indices = @transform_3, window_bounds = array<i64: 32, 1>}]} {
    %c0 = arith.constant 0 : index
    %c0_0 = arith.constant 0 : index
    %0 = vector.load %arg1[%c0, %c0_0] : memref<32x16xf32, #tpu.memory_space<vmem>>, vector<32x16xf32>
    %c0_1 = arith.constant 0 : index
    %c0_2 = arith.constant 0 : index
    %1 = vector.load %arg2[%c0_1, %c0_2] : memref<16x16xf32, #tpu.memory_space<vmem>>, vector<16x16xf32>
    %cst = arith.constant dense<0.000000e+00> : vector<32x16xf32>
    %2 = tpu.matmul %0, %1, %cst {dimension_numbers = #tpu.dot_dimension_numbers<[1], [0], [0], [1], [0, 0, 1, 1], [], []>} : vector<32x16xf32>, vector<16x16xf32>, vector<32x16xf32> -> vector<32x16xf32>
    %c0_3 = arith.constant 0 : index
    %c0_4 = arith.constant 0 : index
    %3 = vector.load %arg3[%c0_3, %c0_4] : memref<16x16xf32, #tpu.memory_space<vmem>>, vector<16x16xf32>
    %cst_5 = arith.constant dense<0.000000e+00> : vector<32x16xf32>
    %4 = tpu.matmul %0, %3, %cst_5 {dimension_numbers = #tpu.dot_dimension_numbers<[1], [0], [0], [1], [0, 0, 1, 1], [], []>} : vector<32x16xf32>, vector<16x16xf32>, vector<32x16xf32> -> vector<32x16xf32>
    %5 = arith.mulf %2, %2 : vector<32x16xf32>
    %6 = arith.mulf %4, %4 : vector<32x16xf32>
    %7 = arith.addf %5, %6 : vector<32x16xf32>
    %c32_i32 = arith.constant 32 : i32
    %8 = arith.muli %arg0, %c32_i32 : i32
    %9 = tpu.iota {dimensions = array<i32: 0>} : vector<32x1xi32>
    %10 = vector.broadcast %8 : i32 to vector<32x1xi32>
    %11 = arith.addi %10, %9 : vector<32x1xi32>
    %c64_i32 = arith.constant 64 : i32
    %12 = vector.broadcast %c64_i32 : i32 to vector<32x1xi32>
    %13 = arith.cmpi slt, %11, %12 : vector<32x1xi32>
    %cst_6 = arith.constant 0.000000e+00 : f32
    %14 = vector.shape_cast %13 : vector<32x1xi1> to vector<32x1xi1>
    %15 = vector.broadcast %14 : vector<32x1xi1> to vector<32x16xi1>
    %16 = vector.broadcast %cst_6 : f32 to vector<32x16xf32>
    %17 = arith.select %15, %16, %7 : vector<32x16xi1>, vector<32x16xf32>
    %18 = tpu.iota {dimensions = array<i32: 1>} : vector<32x16xi32>
    %cst_7 = arith.constant dense<0xFF800000> : vector<32xf32>
    %19 = vector.multi_reduction <maximumf>, %17, %cst_7 [1] : vector<32x16xf32> to vector<32xf32>
    %20 = vector.shape_cast %19 : vector<32xf32> to vector<32x1xf32>
    %21 = vector.broadcast %20 : vector<32x1xf32> to vector<32x16xf32>
    %22 = arith.cmpf oeq, %17, %21 : vector<32x16xf32>
    %c16_i32 = arith.constant 16 : i32
    %23 = vector.broadcast %c16_i32 : i32 to vector<32x16xi32>
    %24 = arith.select %22, %18, %23 : vector<32x16xi1>, vector<32x16xi32>
    %cst_8 = arith.constant dense<2147483647> : vector<32xi32>
    %25 = vector.multi_reduction <minsi>, %24, %cst_8 [1] : vector<32x16xi32> to vector<32xi32>
    %26 = vector.shape_cast %25 : vector<32xi32> to vector<32x1xi32>
    %27 = vector.broadcast %26 : vector<32x1xi32> to vector<32x16xi32>
    %28 = arith.cmpi eq, %18, %27 : vector<32x16xi32>
    %cst_9 = arith.constant 0xFF800000 : f32
    %29 = vector.broadcast %cst_9 : f32 to vector<32x16xf32>
    %30 = arith.select %28, %29, %17 : vector<32x16xi1>, vector<32x16xf32>
    %cst_10 = arith.constant dense<0xFF800000> : vector<32xf32>
    %31 = vector.multi_reduction <maximumf>, %30, %cst_10 [1] : vector<32x16xf32> to vector<32xf32>
    %32 = vector.shape_cast %31 : vector<32xf32> to vector<32x1xf32>
    %33 = vector.broadcast %32 : vector<32x1xf32> to vector<32x16xf32>
    %34 = arith.cmpf oeq, %30, %33 : vector<32x16xf32>
    %c16_i32_11 = arith.constant 16 : i32
    %35 = vector.broadcast %c16_i32_11 : i32 to vector<32x16xi32>
    %36 = arith.select %34, %18, %35 : vector<32x16xi1>, vector<32x16xi32>
    %cst_12 = arith.constant dense<2147483647> : vector<32xi32>
    %37 = vector.multi_reduction <minsi>, %36, %cst_12 [1] : vector<32x16xi32> to vector<32xi32>
    %38 = vector.shape_cast %37 : vector<32xi32> to vector<32x1xi32>
    %39 = vector.broadcast %38 : vector<32x1xi32> to vector<32x16xi32>
    %40 = arith.cmpi eq, %18, %39 : vector<32x16xi32>
    %cst_13 = arith.constant 0xFF800000 : f32
    %41 = vector.broadcast %cst_13 : f32 to vector<32x16xf32>
    %42 = arith.select %40, %41, %30 : vector<32x16xi1>, vector<32x16xf32>
    %cst_14 = arith.constant dense<0xFF800000> : vector<32xf32>
    %43 = vector.multi_reduction <maximumf>, %42, %cst_14 [1] : vector<32x16xf32> to vector<32xf32>
    %44 = vector.shape_cast %43 : vector<32xf32> to vector<32x1xf32>
    %45 = vector.broadcast %44 : vector<32x1xf32> to vector<32x16xf32>
    %46 = arith.cmpf oeq, %42, %45 : vector<32x16xf32>
    %c16_i32_15 = arith.constant 16 : i32
    %47 = vector.broadcast %c16_i32_15 : i32 to vector<32x16xi32>
    %48 = arith.select %46, %18, %47 : vector<32x16xi1>, vector<32x16xi32>
    %cst_16 = arith.constant dense<2147483647> : vector<32xi32>
    %49 = vector.multi_reduction <minsi>, %48, %cst_16 [1] : vector<32x16xi32> to vector<32xi32>
    %50 = vector.shape_cast %49 : vector<32xi32> to vector<32x1xi32>
    %51 = vector.broadcast %50 : vector<32x1xi32> to vector<32x16xi32>
    %52 = arith.cmpi eq, %18, %51 : vector<32x16xi32>
    %cst_17 = arith.constant 0xFF800000 : f32
    %53 = vector.broadcast %cst_17 : f32 to vector<32x16xf32>
    %54 = arith.select %52, %53, %42 : vector<32x16xi1>, vector<32x16xf32>
    %cst_18 = arith.constant dense<0xFF800000> : vector<32xf32>
    %55 = vector.multi_reduction <maximumf>, %54, %cst_18 [1] : vector<32x16xf32> to vector<32xf32>
    %56 = vector.shape_cast %55 : vector<32xf32> to vector<32x1xf32>
    %57 = vector.broadcast %56 : vector<32x1xf32> to vector<32x16xf32>
    %58 = arith.cmpf oeq, %54, %57 : vector<32x16xf32>
    %c16_i32_19 = arith.constant 16 : i32
    %59 = vector.broadcast %c16_i32_19 : i32 to vector<32x16xi32>
    %60 = arith.select %58, %18, %59 : vector<32x16xi1>, vector<32x16xi32>
    %cst_20 = arith.constant dense<2147483647> : vector<32xi32>
    %61 = vector.multi_reduction <minsi>, %60, %cst_20 [1] : vector<32x16xi32> to vector<32xi32>
    %62 = vector.shape_cast %61 : vector<32xi32> to vector<32x1xi32>
    %63 = vector.broadcast %62 : vector<32x1xi32> to vector<32x16xi32>
    %64 = arith.cmpi eq, %18, %63 : vector<32x16xi32>
    %cst_21 = arith.constant 0xFF800000 : f32
    %65 = vector.broadcast %cst_21 : f32 to vector<32x16xf32>
    %66 = arith.select %64, %65, %54 : vector<32x16xi1>, vector<32x16xf32>
    %cst_22 = arith.constant dense<0xFF800000> : vector<32xf32>
    %67 = vector.multi_reduction <maximumf>, %66, %cst_22 [1] : vector<32x16xf32> to vector<32xf32>
    %68 = vector.shape_cast %67 : vector<32xf32> to vector<32x1xf32>
    %c0_23 = arith.constant 0 : index
    %c0_24 = arith.constant 0 : index
    %69 = vector.load %arg4[%c0_23, %c0_24] : memref<32x1xf32, #tpu.memory_space<vmem>>, vector<32x1xf32>
    tpu.vector_store %arg4[%c0_23, %c0_24], %68 {strides = array<i32>} : memref<32x1xf32, #tpu.memory_space<vmem>>, vector<32x1xf32>,
    return
  }
  func.func @transform_0(%arg0: i32) -> (i32, i32) {
    %c0_i32 = arith.constant 0 : i32
    %c0_i32_0 = arith.constant 0 : i32
    return %arg0, %c0_i32 : i32, i32
  }
  func.func @transform_1(%arg0: i32) -> (i32, i32) {
    %c0_i32 = arith.constant 0 : i32
    %c0_i32_0 = arith.constant 0 : i32
    %c0_i32_1 = arith.constant 0 : i32
    return %c0_i32, %c0_i32_0 : i32, i32
  }
  func.func @transform_2(%arg0: i32) -> (i32, i32) {
    %c0_i32 = arith.constant 0 : i32
    %c0_i32_0 = arith.constant 0 : i32
    %c0_i32_1 = arith.constant 0 : i32
    return %c0_i32, %c0_i32_0 : i32, i32
  }
  func.func @transform_3(%arg0: i32) -> (i32, i32) {
    %c0_i32 = arith.constant 0 : i32
    %c0_i32_0 = arith.constant 0 : i32
    return %arg0, %c0_i32 : i32, i32
  }
}

</mosaic_0001>

<bundles_post_ra>
// kernel: tpu_custom_call.1
= control target key start
LH: loop header
LB: loop body
LE: loop exit
PB: predicated region body
PF: predicated region fallthrough
CT: control target
= control target key end

     0   :  { %s919_s12 = smov 0   ;;  %s1117_s0 = inlined_call_operand.vmem [shape: f32[128,16], index: 0, kind: input, shape index: {}]   ;;  %s1118_s1 = inlined_call_operand.vmem [shape: f32[16,16], index: 1, kind: input, shape index: {}]   ;;  %s1119_s2 = inlined_call_operand.vmem [shape: f32[16,16], index: 2, kind: input, shape index: {}]   ;;  %s1120_s3 = inlined_call_operand.vmem [shape: f32[128,1], index: 3, kind: output, shape index: {}]  }
   0x1 LB: > { %s831_s13 = sadd.s32 4294967295, %s897_s12   ;;  %p835_p0 = scmp.ge.s32.totalorder %s897_s12, 1  ;;  %s897_s12 = sphi %s919_s12, %s13_s12  }
   0x2   : > { %p138_p1 = scmp.lt.s32.totalorder %s897_s12, 5 }
   0x4   : > { %p139_p2 = pnand %p835_p0, %p138_p1 }
   0x5   : > { %s836_s20 = sshll.u32 (!%p139_p2), %s831_s13, 2  ;;  %s848_s27 = sshll.u32 (!%p139_p2), %s831_s13, 5 }
   0x6   : > { %142 = sbr.rel (%p139_p2) target bundleno = 2086 (0x826), region = 32  ;;  %p163_p3 = scmp.lt.s32.totalorder (!%p139_p2), %s836_s20, 15 }
   0xb   : > { %v179_v0 = vld [vmem:[%s1118_s1 + $0x8] sm:$0xff]  ;;  %v178_v2 = vld [vmem:[%s1118_s1] sm:$0xff]  ;;  %s1122_s20 = smov (!%p163_p3, %s836_s20), 15  ;;  %vm180_vm0 = vcmask 130048   ;;  %v378_v8 = vlaneseq  ;;  %v383_v11 = vstv %s848_s27 }
   0xc   : > { %v279_v1 = vld [vmem:[%s1119_s2 + $0x8] sm:$0xff]  ;;  %863 = vmatprep.subr.mxu0 %v179_v0  ;;  %v278_v3 = vld [vmem:[%s1119_s2] sm:$0xff]  ;;  %s837_s23 = sshll.u32 %s1122_s20, 3 }
   0xd   : > { %873 = vmatprep.subr.mxu1 %v279_v1  ;;  %864 = vmatpush3.msra.mxu0 %v179_v0  ;;  %s166_s26 = scalar_lea.vmem %s1117_s0, %s837_s23  ;;  %v379_v9 = vshrl.u32 %v378_v8, 7  ;;  %v975_v46 = vand.u32 127, %v378_v8  ;;  %s172_s30 = scalar_lea.vmem %s1120_s3, %s837_s23 }
   0xe   : > { %874 = vmatpush3.msra.mxu1 %v279_v1  ;;  %865 = vmatprep.subr.mxu0 %v178_v2  ;;  %v174_v4 = vld [vmem:[%s166_s26] sm:$0xff]  ;;  %v175_v5 = vld [vmem:[%s166_s26 + $0x8] sm:$0xff]  ;;  %v176_v6 = vld [vmem:[%s166_s26 + $0x10] sm:$0xff] }
   0xf   : > { %875 = vmatprep.subr.mxu1 %v278_v3  ;;  %866 = vmatpush3.msra.mxu0 %v178_v2  ;;  %v177_v7 = vld [vmem:[%s166_s26 + $0x18] sm:$0xff]  ;;  %v380_v10 = vadd.s32 8, %v379_v9  ;;  %v384_v14 = vadd.s32 %v383_v11, %v379_v9  ;;  %v381_v15 = vadd.s32 16, %v379_v9  ;;  %v382_v21 = vadd.s32 24, %v379_v9 }
  0x10   : > { %876 = vmatpush3.msra.mxu1 %v278_v3  ;;  %867 = vmatprep.mubr.msk.f32.mxu0 %vm180_vm0, %v174_v4 }
  0x11   : > { %877 = vmatprep.mubr.msk.f32.mxu1 %vm180_vm0, %v174_v4  ;;  %868 = vmatmul.mubr.msk.f32.vlgmr.msra.gmra.mxu0 %vm180_vm0, %v175_v5  ;;  %v385_v20 = vadd.s32 %v383_v11, %v380_v10  ;;  %vm388_vm1 = vcmp.lt.s32.totalorder %v384_v14, 64  ;;  %v386_v26 = vadd.s32 %v383_v11, %v381_v15  ;;  %v387_v33 = vadd.s32 %v383_v11, %v382_v21 }
  0x12   : > { %878 = vmatmul.mubr.msk.f32.vlgmr.msra.gmra.mxu1 %vm180_vm0, %v175_v5  ;;  %870 = vmatprep.mubr.msk.f32.mxu0 %vm180_vm0, %v176_v6 }
  0x13   : > { %880 = vmatprep.mubr.msk.f32.mxu1 %vm180_vm0, %v176_v6  ;;  %vm389_vm2 = vcmp.lt.s32.totalorder %v385_v20, 64  ;;  %vm390_vm3 = vcmp.lt.s32.totalorder %v386_v26, 64  ;;  %vm391_vm4 = vcmp.lt.s32.totalorder %v387_v33, 64 }
  0x15   : > { %871 = vmatmul.mubr.msk.f32.gmra.mxu0 %vm180_vm0, %v177_v7 }
  0x16   : > { %881 = vmatmul.mubr.msk.f32.gmra.mxu1 %vm180_vm0, %v177_v7 }
  0xd1   : > { %v869_v12 = vpop.f32.mrf.mxu0 }
  0xd2   : > { %v879_v13 = vpop.f32.mrf.mxu1  ;;  %v366_v16 = vmul.f32 %v869_v12, %v869_v12 }
  0xd3   : > { %v370_v17 = vmul.f32 %v879_v13, %v879_v13  ;;  %v259_v18 = vpop.f32.mrf.mxu0 }
  0xd4   : > { %v346_v19 = vpop.f32.mrf.mxu1  ;;  %v365_v22 = vmul.f32 %v259_v18, %v259_v18 }
  0xd5   : > { %v369_v23 = vmul.f32 %v346_v19, %v346_v19  ;;  %v872_v24 = vpop.f32.mrf.mxu0  ;;  %v374_v27 = vadd.f32 %v370_v17, %v366_v16 }
  0xd6   : > { %v882_v25 = vpop.f32.mrf.mxu1  ;;  %v368_v29 = vmul.f32 %v872_v24, %v872_v24 }
  0xd7   : > { %v373_v28 = vadd.f32 %v369_v23, %v365_v22  ;;  %v372_v30 = vmul.f32 %v882_v25, %v882_v25  ;;  %v269_v31 = vpop.f32.mrf.mxu0  ;;  %v963_v40 = vsel %vm389_vm2, 0.0, %v374_v27 }
  0xd8   : > { %v356_v32 = vpop.f32.mrf.mxu1  ;;  %v367_v34 = vmul.f32 %v269_v31, %v269_v31  ;;  %v409_v42 = vsel %vm180_vm0, %v963_v40, -inf }
  0xd9   : > { %v371_v35 = vmul.f32 %v356_v32, %v356_v32  ;;  %v959_v36 = vsel %vm388_vm1, 0.0, %v373_v28  ;;  %v376_v38 = vadd.f32 %v372_v30, %v368_v29 }
  0xda   : > { %v406_v37 = vsel %vm180_vm0, %v959_v36, -inf }
  0xdb   : > { %v375_v39 = vadd.f32 %v371_v35, %v367_v34  ;;  %407 = vmax.xlane.f32.xlu0 %v406_v37  ;;  %v971_v44 = vsel %vm391_vm4, 0.0, %v376_v38 }
  0xdc   : > { %v415_v45 = vsel %vm180_vm0, %v971_v44, -inf }
  0xdd   : > { %v965_v41 = vsel %vm390_vm3, 0.0, %v375_v39 }
  0xde   : > { %v412_v43 = vsel %vm180_vm0, %v965_v41, -inf }
  0xdf   : > { %410 = vmax.xlane.f32.xlu0 %v409_v42  ;;  %413 = vmax.xlane.f32.xlu1 %v412_v43 }
  0xe3   : > { %416 = vmax.xlane.f32.xlu1 %v415_v45 }
 0x164   : > { %v408_v47 = vpop.xlane.xlu0 %407 }
 0x165   : > { %vm418_vm5 = vcmp.eq.f32.partialorder %v959_v36, %v408_v47 }
 0x166   : > { %v422_v48 = vsel %vm418_vm5, %v975_v46, 16 }
 0x167   : > { %v426_v49 = vsel %vm180_vm0, %v422_v48, 2147483647 }
 0x168   : > { %v411_v50 = vpop.xlane.xlu0 %410  ;;  %v414_v51 = vpop.xlane.xlu1 %413  ;;  %v428_v52 = vshra.s32 %v426_v49, 16  ;;  %v427_v3 = vand.u32 65535, %v426_v49 }
 0x169   : > { %vm419_vm6 = vcmp.eq.f32.partialorder %v963_v40, %v411_v50  ;;  %vm420_vm7 = vcmp.eq.f32.partialorder %v965_v41, %v414_v51 }
 0x16a   : > { %v423_v53 = vsel %vm419_vm6, %v975_v46, 16  ;;  %v424_v54 = vsel %vm420_vm7, %v975_v46, 16  ;;  %v430_v55 = vcvt.s32.f32 %v428_v52  ;;  %v429_v5 = vcvt.s32.f32 %v427_v3 }
 0x16b   : > { %v441_v56 = vsel %vm180_vm0, %v423_v53, 2147483647  ;;  %v456_v57 = vsel %vm180_vm0, %v424_v54, 2147483647 }
 0x16c   : > { %431 = vmin.xlane.f32.xlu0 %v430_v55  ;;  %v417_v58 = vpop.xlane.xlu1 %416  ;;  %v443_v59 = vshra.s32 %v441_v56, 16  ;;  %v458_v60 = vshra.s32 %v456_v57, 16  ;;  %v457_v6 = vand.u32 65535, %v456_v57  ;;  %v442_v7 = vand.u32 65535, %v441_v56 }
 0x16d   : > { %vm421_vm8 = vcmp.eq.f32.partialorder %v971_v44, %v417_v58 }
 0x16e   : > { %v425_v61 = vsel %vm421_vm8, %v975_v46, 16  ;;  %v445_v62 = vcvt.s32.f32 %v443_v59  ;;  %v460_v63 = vcvt.s32.f32 %v458_v60  ;;  %v459_v11 = vcvt.s32.f32 %v457_v6 }
 0x16f   : > { %v471_v0 = vsel %vm180_vm0, %v425_v61, 2147483647  ;;  %v444_v12 = vcvt.s32.f32 %v442_v7 }
 0x170   : > { %446 = vmin.xlane.f32.xlu1 %v445_v62  ;;  %461 = vmin.xlane.f32.xlu0 %v460_v63  ;;  %v473_v1 = vshra.s32 %v471_v0, 16  ;;  %v472_v13 = vand.u32 65535, %v471_v0 }
 0x172   : > { %v475_v2 = vcvt.s32.f32 %v473_v1  ;;  %v474_v17 = vcvt.s32.f32 %v472_v13 }
 0x174   : > { %476 = vmin.xlane.f32.xlu1 %v475_v2 }
 0x1f5   : > { %v432_v4 = vpop.xlane.xlu0 %431 }
 0x1f6   : > { %vm433_vm9 = vcmp.eq.f32.partialorder %v430_v55, %v432_v4  ;;  %v438_v19 = vcvt.f32.s32 %v432_v4 }
 0x1f7   : > { %v434_v8 = vsel %vm433_vm9, %v429_v5, inf }
 0x1f8   : > { %435 = vmin.xlane.f32.xlu0 %v434_v8  ;;  %v439_v23 = vshll.u32 %v438_v19, 16 }
 0x1f9   : > { %v462_v9 = vpop.xlane.xlu0 %461  ;;  %v447_v10 = vpop.xlane.xlu1 %446 }
 0x1fa   : > { %vm463_vm10 = vcmp.eq.f32.partialorder %v460_v63, %v462_v9  ;;  %vm448_vm11 = vcmp.eq.f32.partialorder %v445_v62, %v447_v10  ;;  %v468_v20 = vcvt.f32.s32 %v462_v9  ;;  %v453_v21 = vcvt.f32.s32 %v447_v10 }
 0x1fb   : > { %v464_v14 = vsel %vm463_vm10, %v459_v11, inf  ;;  %v449_v15 = vsel %vm448_vm11, %v444_v12, inf }
 0x1fc   : > { %465 = vmin.xlane.f32.xlu0 %v464_v14  ;;  %450 = vmin.xlane.f32.xlu1 %v449_v15  ;;  %v469_v26 = vshll.u32 %v468_v20, 16  ;;  %v454_v27 = vshll.u32 %v453_v21, 16 }
 0x1fd   : > { %v477_v16 = vpop.xlane.xlu1 %476 }
 0x1fe   : > { %vm478_vm12 = vcmp.eq.f32.partialorder %v475_v2, %v477_v16  ;;  %v483_v30 = vcvt.f32.s32 %v477_v16 }
 0x1ff   : > { %v479_v18 = vsel %vm478_vm12, %v474_v17, inf }
 0x200   : > { %480 = vmin.xlane.f32.xlu1 %v479_v18  ;;  %v484_v39 = vshll.u32 %v483_v30, 16 }
 0x281   : > { %v436_v22 = vpop.xlane.xlu0 %435 }
 0x282   : > { %v437_v24 = vcvt.f32.s32 %v436_v22 }
 0x284   : > { %v440_v25 = vadd.s32 %v439_v23, %v437_v24 }
 0x285   : > { %v466_v28 = vpop.xlane.xlu0 %465  ;;  %v451_v29 = vpop.xlane.xlu1 %450 }
 0x286   : > { %v467_v31 = vcvt.f32.s32 %v466_v28  ;;  %v452_v32 = vcvt.f32.s32 %v451_v29  ;;  %vm486_vm13 = vcmp.eq.s32.totalorder %v975_v46, %v440_v25 }
 0x287   : > { %v991_v33 = vsel %vm486_vm13, -inf, %v959_v36 }
 0x288   : > { %v470_v34 = vadd.s32 %v469_v26, %v467_v31  ;;  %v455_v35 = vadd.s32 %v454_v27, %v452_v32  ;;  %v494_v37 = vsel %vm180_vm0, %v991_v33, -inf }
 0x289   : > { %495 = vmax.xlane.f32.xlu0 %v494_v37  ;;  %v481_v38 = vpop.xlane.xlu1 %480 }
 0x28a   : > { %v482_v42 = vcvt.f32.s32 %v481_v38  ;;  %vm488_vm14 = vcmp.eq.s32.totalorder %v975_v46, %v470_v34  ;;  %vm487_vm15 = vcmp.eq.s32.totalorder %v975_v46, %v455_v35 }
 0x28b   : > { %v998_v43 = vsel %vm488_vm14, -inf, %v965_v41  ;;  %v1001_v45 = vsel %vm487_vm15, -inf, %v963_v40 }
 0x28c   : > { %v485_v36 = vadd.s32 %v484_v39, %v482_v42  ;;  %v500_v47 = vsel %vm180_vm0, %v998_v43, -inf  ;;  %v497_v48 = vsel %vm180_vm0, %v1001_v45, -inf }
 0x28d   : > { %501 = vmax.xlane.f32.xlu0 %v500_v47  ;;  %498 = vmax.xlane.f32.xlu1 %v497_v48 }
 0x28e   : > { %vm489_vm1 = vcmp.eq.s32.totalorder %v975_v46, %v485_v36 }
 0x28f   : > { %v1009_v49 = vsel %vm489_vm1, -inf, %v971_v44 }
 0x290   : > { %v503_v41 = vsel %vm180_vm0, %v1009_v49, -inf }
 0x291   : > { %504 = vmax.xlane.f32.xlu1 %v503_v41 }
 0x312   : > { %v496_v40 = vpop.xlane.xlu0 %495 }
 0x313   : > { %vm506_vm2 = vcmp.eq.f32.partialorder %v991_v33, %v496_v40 }
 0x314   : > { %v510_v50 = vsel %vm506_vm2, %v975_v46, 16 }
 0x315   : > { %v514_v51 = vsel %vm180_vm0, %v510_v50, 2147483647 }
 0x316   : > { %v502_v52 = vpop.xlane.xlu0 %501  ;;  %v499_v53 = vpop.xlane.xlu1 %498  ;;  %v516_v54 = vshra.s32 %v514_v51, 16  ;;  %v515_v4 = vand.u32 65535, %v514_v51 }
 0x317   : > { %vm508_vm3 = vcmp.eq.f32.partialorder %v998_v43, %v502_v52  ;;  %vm507_vm4 = vcmp.eq.f32.partialorder %v1001_v45, %v499_v53 }
 0x318   : > { %v512_v44 = vsel %vm508_vm3, %v975_v46, 16  ;;  %v511_v55 = vsel %vm507_vm4, %v975_v46, 16  ;;  %v518_v56 = vcvt.s32.f32 %v516_v54  ;;  %v517_v6 = vcvt.s32.f32 %v515_v4 }
 0x319   : > { %v544_v57 = vsel %vm180_vm0, %v512_v44, 2147483647  ;;  %v529_v58 = vsel %vm180_vm0, %v511_v55, 2147483647 }
 0x31a   : > { %519 = vmin.xlane.f32.xlu0 %v518_v56  ;;  %v505_v59 = vpop.xlane.xlu1 %504  ;;  %v546_v60 = vshra.s32 %v544_v57, 16  ;;  %v531_v61 = vshra.s32 %v529_v58, 16  ;;  %v545_v7 = vand.u32 65535, %v544_v57  ;;  %v530_v8 = vand.u32 65535, %v529_v58 }
 0x31b   : > { %vm509_vm5 = vcmp.eq.f32.partialorder %v1009_v49, %v505_v59 }
 0x31c   : > { %v513_v62 = vsel %vm509_vm5, %v975_v46, 16  ;;  %v548_v63 = vcvt.s32.f32 %v546_v60  ;;  %v533_v0 = vcvt.s32.f32 %v531_v61  ;;  %v547_v12 = vcvt.s32.f32 %v545_v7 }
 0x31d   : > { %v559_v1 = vsel %vm180_vm0, %v513_v62, 2147483647  ;;  %v532_v13 = vcvt.s32.f32 %v530_v8 }
 0x31e   : > { %549 = vmin.xlane.f32.xlu0 %v548_v63  ;;  %534 = vmin.xlane.f32.xlu1 %v533_v0  ;;  %v561_v2 = vshra.s32 %v559_v1, 16  ;;  %v560_v14 = vand.u32 65535, %v559_v1 }
 0x320   : > { %v563_v3 = vcvt.s32.f32 %v561_v2  ;;  %v562_v18 = vcvt.s32.f32 %v560_v14 }
 0x322   : > { %564 = vmin.xlane.f32.xlu1 %v563_v3 }
 0x3a3   : > { %v520_v5 = vpop.xlane.xlu0 %519 }
 0x3a4   : > { %vm521_vm6 = vcmp.eq.f32.partialorder %v518_v56, %v520_v5  ;;  %v526_v20 = vcvt.f32.s32 %v520_v5 }
 0x3a5   : > { %v522_v9 = vsel %vm521_vm6, %v517_v6, inf }
 0x3a6   : > { %523 = vmin.xlane.f32.xlu0 %v522_v9  ;;  %v527_v24 = vshll.u32 %v526_v20, 16 }
 0x3a7   : > { %v550_v10 = vpop.xlane.xlu0 %549  ;;  %v535_v11 = vpop.xlane.xlu1 %534 }
 0x3a8   : > { %vm551_vm7 = vcmp.eq.f32.partialorder %v548_v63, %v550_v10  ;;  %vm536_vm8 = vcmp.eq.f32.partialorder %v533_v0, %v535_v11  ;;  %v556_v21 = vcvt.f32.s32 %v550_v10  ;;  %v541_v22 = vcvt.f32.s32 %v535_v11 }
 0x3a9   : > { %v552_v15 = vsel %vm551_vm7, %v547_v12, inf  ;;  %v537_v16 = vsel %vm536_vm8, %v532_v13, inf }
 0x3aa   : > { %553 = vmin.xlane.f32.xlu0 %v552_v15  ;;  %538 = vmin.xlane.f32.xlu1 %v537_v16  ;;  %v557_v27 = vshll.u32 %v556_v21, 16  ;;  %v542_v28 = vshll.u32 %v541_v22, 16 }
 0x3ab   : > { %v565_v17 = vpop.xlane.xlu1 %564 }
 0x3ac   : > { %vm566_vm9 = vcmp.eq.f32.partialorder %v563_v3, %v565_v17  ;;  %v571_v31 = vcvt.f32.s32 %v565_v17 }
 0x3ad   : > { %v567_v19 = vsel %vm566_vm9, %v562_v18, inf }
 0x3ae   : > { %568 = vmin.xlane.f32.xlu1 %v567_v19  ;;  %v572_v36 = vshll.u32 %v571_v31, 16 }
 0x42f   : > { %v524_v23 = vpop.xlane.xlu0 %523 }
 0x430   : > { %v525_v25 = vcvt.f32.s32 %v524_v23 }
 0x432   : > { %v528_v26 = vadd.s32 %v527_v24, %v525_v25 }
 0x433   : > { %v554_v29 = vpop.xlane.xlu0 %553  ;;  %v539_v30 = vpop.xlane.xlu1 %538 }
 0x434   : > { %v555_v32 = vcvt.f32.s32 %v554_v29  ;;  %v540_v34 = vcvt.f32.s32 %v539_v30  ;;  %vm574_vm10 = vcmp.eq.s32.totalorder %v975_v46, %v528_v26 }
 0x435   : > { %v1027_v35 = vsel %vm574_vm10, -inf, %v991_v33 }
 0x436   : > { %v558_v37 = vadd.s32 %v557_v27, %v555_v32  ;;  %v543_v38 = vadd.s32 %v542_v28, %v540_v34  ;;  %v582_v39 = vsel %vm180_vm0, %v1027_v35, -inf }
 0x437   : > { %583 = vmax.xlane.f32.xlu0 %v582_v39  ;;  %v569_v42 = vpop.xlane.xlu1 %568 }
 0x438   : > { %v570_v47 = vcvt.f32.s32 %v569_v42  ;;  %vm576_vm11 = vcmp.eq.s32.totalorder %v975_v46, %v558_v37  ;;  %vm575_vm12 = vcmp.eq.s32.totalorder %v975_v46, %v543_v38 }
 0x439   : > { %v1034_v48 = vsel %vm576_vm11, -inf, %v998_v43  ;;  %v1037_v41 = vsel %vm575_vm12, -inf, %v1001_v45 }
 0x43a   : > { %v573_v33 = vadd.s32 %v572_v36, %v570_v47  ;;  %v588_v40 = vsel %vm180_vm0, %v1034_v48, -inf  ;;  %v585_v50 = vsel %vm180_vm0, %v1037_v41, -inf }
 0x43b   : > { %589 = vmax.xlane.f32.xlu0 %v588_v40  ;;  %586 = vmax.xlane.f32.xlu1 %v585_v50 }
 0x43c   : > { %vm577_vm13 = vcmp.eq.s32.totalorder %v975_v46, %v573_v33 }
 0x43d   : > { %v1045_v51 = vsel %vm577_vm13, -inf, %v1009_v49 }
 0x43e   : > { %v591_v43 = vsel %vm180_vm0, %v1045_v51, -inf }
 0x43f   : > { %592 = vmax.xlane.f32.xlu1 %v591_v43 }
 0x4c0   : > { %v584_v45 = vpop.xlane.xlu0 %583 }
 0x4c1   : > { %vm594_vm14 = vcmp.eq.f32.partialorder %v1027_v35, %v584_v45 }
 0x4c2   : > { %v598_v52 = vsel %vm594_vm14, %v975_v46, 16 }
 0x4c3   : > { %v602_v53 = vsel %vm180_vm0, %v598_v52, 2147483647 }
 0x4c4   : > { %v590_v54 = vpop.xlane.xlu0 %589  ;;  %v587_v44 = vpop.xlane.xlu1 %586  ;;  %v604_v55 = vshra.s32 %v602_v53, 16  ;;  %v603_v5 = vand.u32 65535, %v602_v53 }
 0x4c5   : > { %vm596_vm15 = vcmp.eq.f32.partialorder %v1034_v48, %v590_v54  ;;  %vm595_vm1 = vcmp.eq.f32.partialorder %v1037_v41, %v587_v44 }
 0x4c6   : > { %v600_v49 = vsel %vm596_vm15, %v975_v46, 16  ;;  %v599_v56 = vsel %vm595_vm1, %v975_v46, 16  ;;  %v606_v57 = vcvt.s32.f32 %v604_v55  ;;  %v605_v7 = vcvt.s32.f32 %v603_v5 }
 0x4c7   : > { %v632_v58 = vsel %vm180_vm0, %v600_v49, 2147483647  ;;  %v617_v59 = vsel %vm180_vm0, %v599_v56, 2147483647 }
 0x4c8   : > { %607 = vmin.xlane.f32.xlu0 %v606_v57  ;;  %v593_v60 = vpop.xlane.xlu1 %592  ;;  %v634_v61 = vshra.s32 %v632_v58, 16  ;;  %v619_v62 = vshra.s32 %v617_v59, 16  ;;  %v633_v8 = vand.u32 65535, %v632_v58  ;;  %v618_v9 = vand.u32 65535, %v617_v59 }
 0x4c9   : > { %vm597_vm2 = vcmp.eq.f32.partialorder %v1045_v51, %v593_v60 }
 0x4ca   : > { %v601_v63 = vsel %vm597_vm2, %v975_v46, 16  ;;  %v636_v0 = vcvt.s32.f32 %v634_v61  ;;  %v621_v1 = vcvt.s32.f32 %v619_v62  ;;  %v635_v13 = vcvt.s32.f32 %v633_v8 }
 0x4cb   : > { %v647_v2 = vsel %vm180_vm0, %v601_v63, 2147483647  ;;  %v620_v14 = vcvt.s32.f32 %v618_v9 }
 0x4cc   : > { %637 = vmin.xlane.f32.xlu0 %v636_v0  ;;  %622 = vmin.xlane.f32.xlu1 %v621_v1  ;;  %v649_v3 = vshra.s32 %v647_v2, 16  ;;  %v648_v15 = vand.u32 65535, %v647_v2 }
 0x4ce   : > { %v651_v4 = vcvt.s32.f32 %v649_v3  ;;  %v650_v19 = vcvt.s32.f32 %v648_v15 }
 0x4d0   : > { %652 = vmin.xlane.f32.xlu1 %v651_v4 }
 0x551   : > { %v608_v6 = vpop.xlane.xlu0 %607 }
 0x552   : > { %vm609_vm3 = vcmp.eq.f32.partialorder %v606_v57, %v608_v6  ;;  %v614_v21 = vcvt.f32.s32 %v608_v6 }
 0x553   : > { %v610_v10 = vsel %vm609_vm3, %v605_v7, inf }
 0x554   : > { %611 = vmin.xlane.f32.xlu0 %v610_v10  ;;  %v615_v25 = vshll.u32 %v614_v21, 16 }
 0x555   : > { %v638_v11 = vpop.xlane.xlu0 %637  ;;  %v623_v12 = vpop.xlane.xlu1 %622 }
 0x556   : > { %vm639_vm4 = vcmp.eq.f32.partialorder %v636_v0, %v638_v11  ;;  %vm624_vm5 = vcmp.eq.f32.partialorder %v621_v1, %v623_v12  ;;  %v644_v22 = vcvt.f32.s32 %v638_v11  ;;  %v629_v23 = vcvt.f32.s32 %v623_v12 }
 0x557   : > { %v640_v16 = vsel %vm639_vm4, %v635_v13, inf  ;;  %v625_v17 = vsel %vm624_vm5, %v620_v14, inf }
 0x558   : > { %641 = vmin.xlane.f32.xlu0 %v640_v16  ;;  %626 = vmin.xlane.f32.xlu1 %v625_v17  ;;  %v645_v28 = vshll.u32 %v644_v22, 16  ;;  %v630_v29 = vshll.u32 %v629_v23, 16 }
 0x559   : > { %v653_v18 = vpop.xlane.xlu1 %652 }
 0x55a   : > { %vm654_vm6 = vcmp.eq.f32.partialorder %v651_v4, %v653_v18  ;;  %v659_v32 = vcvt.f32.s32 %v653_v18 }
 0x55b   : > { %v655_v20 = vsel %vm654_vm6, %v650_v19, inf }
 0x55c   : > { %656 = vmin.xlane.f32.xlu1 %v655_v20  ;;  %v660_v33 = vshll.u32 %v659_v32, 16 }
 0x5dd   : > { %v612_v24 = vpop.xlane.xlu0 %611 }
 0x5de   : > { %v613_v26 = vcvt.f32.s32 %v612_v24 }
 0x5e0   : > { %v616_v27 = vadd.s32 %v615_v25, %v613_v26 }
 0x5e1   : > { %v642_v30 = vpop.xlane.xlu0 %641  ;;  %v627_v31 = vpop.xlane.xlu1 %626 }
 0x5e2   : > { %v643_v34 = vcvt.f32.s32 %v642_v30  ;;  %v628_v37 = vcvt.f32.s32 %v627_v31  ;;  %vm662_vm7 = vcmp.eq.s32.totalorder %v975_v46, %v616_v27 }
 0x5e3   : > { %v1063_v38 = vsel %vm662_vm7, -inf, %v1027_v35 }
 0x5e4   : > { %v646_v39 = vadd.s32 %v645_v28, %v643_v34  ;;  %v631_v42 = vadd.s32 %v630_v29, %v628_v37  ;;  %v670_v36 = vsel %vm180_vm0, %v1063_v38, -inf }
 0x5e5   : > { %671 = vmax.xlane.f32.xlu0 %v670_v36  ;;  %v657_v47 = vpop.xlane.xlu1 %656 }
 0x5e6   : > { %v658_v40 = vcvt.f32.s32 %v657_v47  ;;  %vm664_vm8 = vcmp.eq.s32.totalorder %v975_v46, %v646_v39  ;;  %vm663_vm9 = vcmp.eq.s32.totalorder %v975_v46, %v631_v42 }
 0x5e7   : > { %v1070_v50 = vsel %vm664_vm8, -inf, %v1034_v48  ;;  %v1073_v43 = vsel %vm663_vm9, -inf, %v1037_v41  ;;  %vm770_vm8 = vcmask 7168  }
 0x5e8   : > { %v661_v35 = vadd.s32 %v660_v33, %v658_v40  ;;  %v676_v45 = vsel %vm180_vm0, %v1070_v50, -inf  ;;  %v673_v52 = vsel %vm180_vm0, %v1073_v43, -inf }
 0x5e9   : > { %677 = vmax.xlane.f32.xlu0 %v676_v45  ;;  %674 = vmax.xlane.f32.xlu1 %v673_v52 }
 0x5ea   : > { %vm665_vm10 = vcmp.eq.s32.totalorder %v975_v46, %v661_v35 }
 0x5eb   : > { %v1081_v53 = vsel %vm665_vm10, -inf, %v1045_v51 }
 0x5ec   : > { %v679_v48 = vsel %vm180_vm0, %v1081_v53, -inf }
 0x5ed   : > { %680 = vmax.xlane.f32.xlu1 %v679_v48 }
 0x66e   : > { %v672_v41 = vpop.xlane.xlu0 %671 }
 0x66f   : > { %vm682_vm11 = vcmp.eq.f32.partialorder %v1063_v38, %v672_v41 }
 0x670   : > { %v686_v54 = vsel %vm682_vm11, %v975_v46, 16 }
 0x671   : > { %v690_v44 = vsel %vm180_vm0, %v686_v54, 2147483647 }
 0x672   : > { %v678_v55 = vpop.xlane.xlu0 %677  ;;  %v675_v49 = vpop.xlane.xlu1 %674  ;;  %v692_v56 = vshra.s32 %v690_v44, 16  ;;  %v691_v6 = vand.u32 65535, %v690_v44 }
 0x673   : > { %vm684_vm12 = vcmp.eq.f32.partialorder %v1070_v50, %v678_v55  ;;  %vm683_vm13 = vcmp.eq.f32.partialorder %v1073_v43, %v675_v49 }
 0x674   : > { %v688_v51 = vsel %vm684_vm12, %v975_v46, 16  ;;  %v687_v57 = vsel %vm683_vm13, %v975_v46, 16  ;;  %v694_v58 = vcvt.s32.f32 %v692_v56  ;;  %v693_v8 = vcvt.s32.f32 %v691_v6 }
 0x675   : > { %v720_v59 = vsel %vm180_vm0, %v688_v51, 2147483647  ;;  %v705_v60 = vsel %vm180_vm0, %v687_v57, 2147483647 }
 0x676   : > { %695 = vmin.xlane.f32.xlu0 %v694_v58  ;;  %v681_v61 = vpop.xlane.xlu1 %680  ;;  %v722_v62 = vshra.s32 %v720_v59, 16  ;;  %v707_v63 = vshra.s32 %v705_v60, 16  ;;  %v721_v9 = vand.u32 65535, %v720_v59  ;;  %v706_v10 = vand.u32 65535, %v705_v60 }
 0x677   : > { %vm685_vm14 = vcmp.eq.f32.partialorder %v1081_v53, %v681_v61 }
 0x678   : > { %v689_v0 = vsel %vm685_vm14, %v975_v46, 16  ;;  %v724_v1 = vcvt.s32.f32 %v722_v62  ;;  %v709_v2 = vcvt.s32.f32 %v707_v63  ;;  %v723_v14 = vcvt.s32.f32 %v721_v9 }
 0x679   : > { %v735_v3 = vsel %vm180_vm0, %v689_v0, 2147483647  ;;  %v708_v15 = vcvt.s32.f32 %v706_v10 }
 0x67a   : > { %725 = vmin.xlane.f32.xlu0 %v724_v1  ;;  %710 = vmin.xlane.f32.xlu1 %v709_v2  ;;  %v737_v4 = vshra.s32 %v735_v3, 16  ;;  %v736_v16 = vand.u32 65535, %v735_v3 }
 0x67c   : > { %v739_v5 = vcvt.s32.f32 %v737_v4  ;;  %v738_v20 = vcvt.s32.f32 %v736_v16 }
 0x67e   : > { %740 = vmin.xlane.f32.xlu1 %v739_v5 }
 0x6ff   : > { %v696_v7 = vpop.xlane.xlu0 %695 }
 0x700   : > { %vm697_vm15 = vcmp.eq.f32.partialorder %v694_v58, %v696_v7  ;;  %v702_v22 = vcvt.f32.s32 %v696_v7 }
 0x701   : > { %v698_v11 = vsel %vm697_vm15, %v693_v8, inf }
 0x702   : > { %699 = vmin.xlane.f32.xlu0 %v698_v11  ;;  %v703_v26 = vshll.u32 %v702_v22, 16 }
 0x703   : > { %v726_v12 = vpop.xlane.xlu0 %725  ;;  %v711_v13 = vpop.xlane.xlu1 %710 }
 0x704   : > { %vm727_vm1 = vcmp.eq.f32.partialorder %v724_v1, %v726_v12  ;;  %vm712_vm2 = vcmp.eq.f32.partialorder %v709_v2, %v711_v13  ;;  %v732_v23 = vcvt.f32.s32 %v726_v12  ;;  %v717_v24 = vcvt.f32.s32 %v711_v13 }
 0x705   : > { %v728_v17 = vsel %vm727_vm1, %v723_v14, inf  ;;  %v713_v18 = vsel %vm712_vm2, %v708_v15, inf }
 0x706   : > { %729 = vmin.xlane.f32.xlu0 %v728_v17  ;;  %714 = vmin.xlane.f32.xlu1 %v713_v18  ;;  %v733_v29 = vshll.u32 %v732_v23, 16  ;;  %v718_v30 = vshll.u32 %v717_v24, 16 }
 0x707   : > { %v741_v19 = vpop.xlane.xlu1 %740 }
 0x708   : > { %vm742_vm3 = vcmp.eq.f32.partialorder %v739_v5, %v741_v19  ;;  %v747_v34 = vcvt.f32.s32 %v741_v19 }
 0x709   : > { %v743_v21 = vsel %vm742_vm3, %v738_v20, inf }
 0x70a   : > { %744 = vmin.xlane.f32.xlu1 %v743_v21  ;;  %v748_v35 = vshll.u32 %v747_v34, 16 }
 0x78b   : > { %v700_v25 = vpop.xlane.xlu0 %699 }
 0x78c   : > { %v701_v27 = vcvt.f32.s32 %v700_v25 }
 0x78e   : > { %v704_v28 = vadd.s32 %v703_v26, %v701_v27 }
 0x78f   : > { %v730_v31 = vpop.xlane.xlu0 %729  ;;  %v715_v32 = vpop.xlane.xlu1 %714 }
 0x790   : > { %v731_v37 = vcvt.f32.s32 %v730_v31  ;;  %v716_v39 = vcvt.f32.s32 %v715_v32  ;;  %vm750_vm4 = vcmp.eq.s32.totalorder %v975_v46, %v704_v28 }
 0x791   : > { %v754_v42 = vsel %vm750_vm4, -inf, %v1063_v38 }
 0x792   : > { %v734_v36 = vadd.s32 %v733_v29, %v731_v37  ;;  %v719_v47 = vadd.s32 %v718_v30, %v716_v39  ;;  %v758_v33 = vsel %vm180_vm0, %v754_v42, -inf }
 0x793   : > { %759 = vmax.xlane.f32.xlu0 %v758_v33  ;;  %v745_v40 = vpop.xlane.xlu1 %744 }
 0x794   : > { %v746_v45 = vcvt.f32.s32 %v745_v40  ;;  %vm752_vm5 = vcmp.eq.s32.totalorder %v975_v46, %v734_v36  ;;  %vm751_vm6 = vcmp.eq.s32.totalorder %v975_v46, %v719_v47 }
 0x795   : > { %v756_v52 = vsel %vm752_vm5, -inf, %v1070_v50  ;;  %v755_v48 = vsel %vm751_vm6, -inf, %v1073_v43 }
 0x796   : > { %v749_v41 = vadd.s32 %v748_v35, %v746_v45  ;;  %v764_v38 = vsel %vm180_vm0, %v756_v52, -inf  ;;  %v761_v54 = vsel %vm180_vm0, %v755_v48, -inf }
 0x797   : > { %765 = vmax.xlane.f32.xlu0 %v764_v38  ;;  %762 = vmax.xlane.f32.xlu1 %v761_v54 }
 0x798   : > { %vm753_vm7 = vcmp.eq.s32.totalorder %v975_v46, %v749_v41 }
 0x799   : > { %v757_v44 = vsel %vm753_vm7, -inf, %v1081_v53 }
 0x79a   : > { %v767_v55 = vsel %vm180_vm0, %v757_v44, -inf }
 0x79b   : > { %768 = vmax.xlane.f32.xlu1 %v767_v55 }
 0x81c   : > { %v760_v50 = vpop.xlane.xlu0 %759 }
 0x81d   : > { %771 = vst.msk [vmem:[%s172_s30] sm:$0xff] %vm770_vm8, %v760_v50 }
 0x820   : > { %v766_v43 = vpop.xlane.xlu0 %765  ;;  %v763_v49 = vpop.xlane.xlu1 %762 }
 0x821   : > { %773 = vst.msk [vmem:[%s172_s30 + $0x10] sm:$0xff] %vm770_vm8, %v766_v43  ;;  %772 = vst.msk [vmem:[%s172_s30 + $0x8] sm:$0xff] %vm770_vm8, %v763_v49 }
 0x824   : > { %v769_v56 = vpop.xlane.xlu1 %768 }
 0x825   : > { %774 = vst.msk [vmem:[%s172_s30 + $0x18] sm:$0xff] %vm770_vm8, %v769_v56 }
 0x826 PF: > { %s13_s12 = sadd.s32 1, %s897_s12  }
 0x827   : > { %p10_p4 = scmp.ge.s32.totalorder %s13_s12, 6  }
 0x829   :  { %12 = sbr.rel (!%p10_p4) target bundleno = 1 (0x1), region = 62 }

</bundles_post_ra>
